<compile_context>
chip_gen: v7x
topology: tpu7x:2x2x1
jax: 0.10.0
libtpu: 0.0.40
codegen_flags: <defaults>
</compile_context>

<pallas_src>
import jax
import jax.numpy as jnp
from jax.experimental import pallas as pl
from jax.experimental.pallas import tpu as pltpu

N_STATES = 64
N_ACTIONS = 64
HIDDEN = 64
FUSED = 128  # actor half (lanes 0..63) + critic half (lanes 64..127, value in lane 64)


def _round_up(n, m):
    return ((n + m - 1) // m) * m


def _fused_actor_critic_kernel(x_ref, w_ref, b_ref, out_ref):
    """One batch tile of the fused actor+critic MLP.

    x_ref  : (TILE_B, 64)    input states (bf16 or f32)
    w_ref  : (3, 128, 128)   layer-stacked fused weights (resident across grid steps)
    b_ref  : (3, 1, 128)     layer-stacked fused biases (f32)
    out_ref: (TILE_B, 128)   lanes 0..63 = softmax(logits), lane 64 = value, rest = 0 (f32)
    """
    cd = x_ref.dtype  # compute dtype of the MXU inputs (bf16 or f32)

    # layer 1: x @ [wa1 | wv1]  -- slice the Ref so we only load the 64 real rows
    w1 = w_ref[0, :N_STATES, :]
    h = jnp.dot(x_ref[...], w1, preferred_element_type=jnp.float32) + b_ref[0]
    h = jnp.maximum(h, 0.0).astype(cd)

    # layer 2: block_diag(wa2, wv2)
    h = jnp.dot(h, w_ref[1], preferred_element_type=jnp.float32) + b_ref[1]
    h = jnp.maximum(h, 0.0).astype(cd)

    # layer 3: block_diag(wa3, [wv3 | 0]) -> lanes 0..63 logits, lane 64 value (f32 epilogue)
    z = jnp.dot(h, w_ref[2], preferred_element_type=jnp.float32) + b_ref[2]

    # masked, numerically stable softmax over the actor lanes; critic lanes pass through.
    # Full 128-lane vregs + one unmasked full-width store (no sub-vreg slices / concat).
    col = jax.lax.broadcasted_iota(jnp.int32, z.shape, 1)
    is_actor = col < N_ACTIONS
    zm = jnp.where(is_actor, z, -jnp.inf)            # critic lanes -> -inf -> exp == 0
    m = jnp.max(zm, axis=-1, keepdims=True)
    e = jnp.exp(zm - m)
    denom = jnp.sum(e, axis=-1, keepdims=True)
    probs = e / denom                                # exact divide: sums to 1 to f32 rounding
    out_ref[...] = jnp.where(is_actor, probs, z).astype(out_ref.dtype)


def actor_critic_forward(x, w_slab, b_slab, *, tile_b=2048,
                         vmem_limit_bytes=32 * 1024 * 1024):
    """x: (batch, 64); w_slab: (3,128,128) bf16/f32; b_slab: (3,1,128) f32.

    Returns (action, value) with action=(batch,64) softmax probs, value=(batch,1), both f32.
    """
    batch = x.shape[0]
    x = x.astype(w_slab.dtype)  # stream x in the compute dtype (bf16 halves its HBM traffic)

    aligned = _round_up(batch, 8)                       # sublane alignment
    tile_b = _round_up(min(tile_b, aligned), 8)
    # keep at least 2 grid steps when there is enough work so v7x's 2 TensorCores both run
    if aligned > 8 and -(-aligned // tile_b) < 2:
        tile_b = _round_up(-(-aligned // 2), 8)
    padded = _round_up(batch, tile_b)
    if padded != batch:
        x = jnp.pad(x, ((0, padded - batch), (0, 0)))
    grid = (padded // tile_b,)

    out = pl.pallas_call(
        _fused_actor_critic_kernel,
        out_shape=jax.ShapeDtypeStruct((padded, FUSED), jnp.float32),
        grid_spec=pltpu.PrefetchScalarGridSpec(
            num_scalar_prefetch=0,
            grid=grid,
            in_specs=[
                pl.BlockSpec((tile_b, N_STATES), lambda i: (i, 0)),    # streamed batch tiles
                pl.BlockSpec((3, FUSED, FUSED), lambda i: (0, 0, 0)),  # resident weights
                pl.BlockSpec((3, 1, FUSED), lambda i: (0, 0, 0)),      # resident biases
            ],
            out_specs=pl.BlockSpec((tile_b, FUSED), lambda i: (i, 0)),
        ),
        compiler_params=pltpu.CompilerParams(
            dimension_semantics=("parallel",),
            vmem_limit_bytes=vmem_limit_bytes,
        ),
    )(x, w_slab, b_slab)

    action = out[:batch, :N_ACTIONS]
    value = out[:batch, N_ACTIONS:N_ACTIONS + 1]
    return action, value


def init_params(key):
    """Deterministic init matching nn.Linear shapes (weights stored as (in, out))."""
    def linear(k, fan_in, fan_out):
        kw, kb = jax.random.split(k)
        bound = 1.0 / jnp.sqrt(fan_in)
        w = jax.random.uniform(kw, (fan_in, fan_out), jnp.float32, -bound, bound)
        b = jax.random.uniform(kb, (1, fan_out), jnp.float32, -bound, bound)
        return w, b

    keys = jax.random.split(key, 6)
    wa1, ba1 = linear(keys[0], N_STATES, HIDDEN)
    wa2, ba2 = linear(keys[1], HIDDEN, HIDDEN)
    wa3, ba3 = linear(keys[2], HIDDEN, N_ACTIONS)
    wv1, bv1 = linear(keys[3], N_STATES, HIDDEN)
    wv2, bv2 = linear(keys[4], HIDDEN, HIDDEN)
    wv3, bv3 = linear(keys[5], HIDDEN, 1)
    return dict(
        wa1=wa1, ba1=ba1, wa2=wa2, ba2=ba2, wa3=wa3, ba3=ba3,
        wv1=wv1, bv1=bv1, wv2=wv2, bv2=bv2, wv3=wv3, bv3=bv3,
    )


def pack_params(p, compute_dtype=jnp.bfloat16):
    """Pack the 12 per-layer params into a (3,128,128) weight slab + (3,1,128) f32 bias slab."""
    # layer 1: concat actor/critic along output lanes, zero-pad rows to 128
    w1 = jnp.concatenate([p["wa1"], p["wv1"]], axis=1)                 # (64, 128)
    w1 = jnp.pad(w1, ((0, FUSED - N_STATES), (0, 0)))                  # (128, 128)

    def block_diag(a, b):
        out = jnp.zeros((FUSED, FUSED), jnp.float32)
        out = out.at[: a.shape[0], : a.shape[1]].set(a)
        out = out.at[HIDDEN:HIDDEN + b.shape[0], HIDDEN:HIDDEN + b.shape[1]].set(b)
        return out

    w2 = block_diag(p["wa2"], p["wv2"])                                # (128, 128)
    w3 = block_diag(p["wa3"], p["wv3"])                                # (128, 128), value -> lane 64
    w_slab = jnp.stack([w1, w2, w3]).astype(compute_dtype)             # (3, 128, 128)

    b1 = jnp.concatenate([p["ba1"], p["bv1"]], axis=1)                 # (1, 128)
    b2 = jnp.concatenate([p["ba2"], p["bv2"]], axis=1)                 # (1, 128)
    b3 = jnp.concatenate(
        [p["ba3"], jnp.pad(p["bv3"], ((0, 0), (0, HIDDEN - 1)))], axis=1)  # (1, 128)
    b_slab = jnp.stack([b1, b2, b3]).astype(jnp.float32)               # (3, 1, 128), f32 biases
    return w_slab, b_slab


def reference_forward(x, p, compute_dtype=jnp.float32):
    """Pure-JAX reference. With compute_dtype=f32 this is the exact torch forward; with bf16
    it applies the same casts the kernel does (bf16 matmul inputs, f32 accumulation/bias)."""
    f32 = jnp.float32

    def dense(v, w, b):
        return jnp.dot(v.astype(compute_dtype), w.astype(compute_dtype),
                       preferred_element_type=f32) + b

    h = jnp.maximum(dense(x, p["wa1"], p["ba1"]), 0.0)
    h = jnp.maximum(dense(h, p["wa2"], p["ba2"]), 0.0)
    logits = dense(h, p["wa3"], p["ba3"])
    action = jax.nn.softmax(logits, axis=-1)
    g = jnp.maximum(dense(x, p["wv1"], p["bv1"]), 0.0)
    g = jnp.maximum(dense(g, p["wv2"], p["bv2"]), 0.0)
    value = dense(g, p["wv3"], p["bv3"])
    return action, value


if __name__ == "__main__":
    key = jax.random.PRNGKey(0)
    pkey, xkey1, xkey2 = jax.random.split(key, 3)
    params = init_params(pkey)

    w16, b16 = pack_params(params, jnp.bfloat16)   # default streamed-bf16 path
    w32, b32 = pack_params(params, jnp.float32)    # exact-f32 path

    # case 1: small batch (single tile); case 2: non-divisible batch, multi-step grid
    x_small = jax.random.normal(xkey1, (8, N_STATES), jnp.float32)
    x_big = jax.random.normal(xkey2, (200, N_STATES), jnp.float32)

    results = []
    for x in (x_small, x_big):
        a16, v16 = actor_critic_forward(x, w16, b16)              # default tile (splits to >=2 steps)
        a32, v32 = actor_critic_forward(x, w32, b32, tile_b=64)   # exercises padding + pipelining
        results.append((x, a16, v16, a32, v32))
    jax.block_until_ready(results)

    for x, a16, v16, a32, v32 in results:
        a_ref16, v_ref16 = reference_forward(x, params, jnp.bfloat16)
        a_ref32, v_ref32 = reference_forward(x, params, jnp.float32)

        assert a16.shape == a_ref32.shape == (x.shape[0], N_ACTIONS)
        assert v16.shape == v_ref32.shape == (x.shape[0], 1)
        assert a32.shape == a_ref32.shape and v32.shape == v_ref32.shape

        # bf16 streamed path vs matching (bf16-cast, f32-accumulate) reference
        assert jnp.allclose(a16, a_ref16, atol=1e-3, rtol=1e-2)
        assert jnp.allclose(v16, v_ref16, atol=1e-3, rtol=1e-2)
        # f32 path vs exact f32 reference (tolerance covers MXU f32-via-bf16-pass noise)
        assert jnp.allclose(a32, a_ref32, atol=2e-3, rtol=2e-2)
        assert jnp.allclose(v32, v_ref32, atol=5e-3, rtol=2e-2)
        # exact-division softmax: probabilities sum to 1
        assert jnp.allclose(jnp.sum(a16, axis=-1), 1.0, atol=1e-3)
        assert jnp.allclose(jnp.sum(a32, axis=-1), 1.0, atol=1e-3)

    print("KERNEL_OK")
</pallas_src>

<mosaic_0001>
module attributes {stable_mosaic.version = 11 : i64} {
  func.func @_fused_actor_critic_kernel(%arg0: i32, %arg1: memref<8x64xbf16, #tpu.memory_space<vmem>>, %arg2: memref<3x128x128xbf16, #tpu.memory_space<vmem>>, %arg3: memref<3x1x128xf32, #tpu.memory_space<vmem>>, %arg4: memref<8x128xf32, #tpu.memory_space<vmem>>) attributes {dimension_semantics = [#tpu.dimension_semantics<parallel>], iteration_bounds = array<i64: 1>, scalar_prefetch = 0 : i64, scratch_operands = 0 : i64, tpu.core_type = #tpu.core_type<tc>, window_params = [{transform_indices = @transform_0, window_bounds = array<i64: 8, 64>}, {pipeline_mode = #tpu.pipeline_mode<synchronous>, transform_indices = @transform_1, window_bounds = array<i64: 3, 128, 128>}, {pipeline_mode = #tpu.pipeline_mode<synchronous>, transform_indices = @transform_2, window_bounds = array<i64: 3, 1, 128>}, {transform_indices = @transform_3, window_bounds = array<i64: 8, 128>}]} {
    %c0 = arith.constant 0 : index
    %c0_0 = arith.constant 0 : index
    %c0_1 = arith.constant 0 : index
    %0 = vector.load %arg2[%c0, %c0_0, %c0_1] : memref<3x128x128xbf16, #tpu.memory_space<vmem>>, vector<1x64x128xbf16>
    %1 = vector.shape_cast %0 : vector<1x64x128xbf16> to vector<64x128xbf16>
    %c0_2 = arith.constant 0 : index
    %c0_3 = arith.constant 0 : index
    %2 = vector.load %arg1[%c0_2, %c0_3] : memref<8x64xbf16, #tpu.memory_space<vmem>>, vector<8x64xbf16>
    %cst = arith.constant dense<0.000000e+00> : vector<8x128xf32>
    %3 = tpu.matmul %2, %1, %cst {dimension_numbers = #tpu.dot_dimension_numbers<[1], [0], [0], [1], [0, 0, 1, 1], [], []>} : vector<8x64xbf16>, vector<64x128xbf16>, vector<8x128xf32> -> vector<8x128xf32>
    %c0_4 = arith.constant 0 : index
    %c0_5 = arith.constant 0 : index
    %c0_6 = arith.constant 0 : index
    %4 = vector.load %arg3[%c0_4, %c0_5, %c0_6] : memref<3x1x128xf32, #tpu.memory_space<vmem>>, vector<1x1x128xf32>
    %5 = vector.shape_cast %4 : vector<1x1x128xf32> to vector<1x128xf32>
    %6 = vector.broadcast %5 : vector<1x128xf32> to vector<8x128xf32>
    %7 = arith.addf %3, %6 : vector<8x128xf32>
    %cst_7 = arith.constant 0.000000e+00 : f32
    %8 = vector.broadcast %cst_7 : f32 to vector<8x128xf32>
    %9 = arith.maximumf %7, %8 : vector<8x128xf32>
    %10 = arith.truncf %9 : vector<8x128xf32> to vector<8x128xbf16>
    %c1 = arith.constant 1 : index
    %c0_8 = arith.constant 0 : index
    %c0_9 = arith.constant 0 : index
    %11 = vector.load %arg2[%c1, %c0_8, %c0_9] : memref<3x128x128xbf16, #tpu.memory_space<vmem>>, vector<1x128x128xbf16>
    %12 = vector.shape_cast %11 : vector<1x128x128xbf16> to vector<128x128xbf16>
    %cst_10 = arith.constant dense<0.000000e+00> : vector<8x128xf32>
    %13 = tpu.matmul %10, %12, %cst_10 {dimension_numbers = #tpu.dot_dimension_numbers<[1], [0], [0], [1], [0, 0, 1, 1], [], []>} : vector<8x128xbf16>, vector<128x128xbf16>, vector<8x128xf32> -> vector<8x128xf32>
    %c1_11 = arith.constant 1 : index
    %c0_12 = arith.constant 0 : index
    %c0_13 = arith.constant 0 : index
    %14 = vector.load %arg3[%c1_11, %c0_12, %c0_13] : memref<3x1x128xf32, #tpu.memory_space<vmem>>, vector<1x1x128xf32>
    %15 = vector.shape_cast %14 : vector<1x1x128xf32> to vector<1x128xf32>
    %16 = vector.broadcast %15 : vector<1x128xf32> to vector<8x128xf32>
    %17 = arith.addf %13, %16 : vector<8x128xf32>
    %cst_14 = arith.constant 0.000000e+00 : f32
    %18 = vector.broadcast %cst_14 : f32 to vector<8x128xf32>
    %19 = arith.maximumf %17, %18 : vector<8x128xf32>
    %20 = arith.truncf %19 : vector<8x128xf32> to vector<8x128xbf16>
    %c2 = arith.constant 2 : index
    %c0_15 = arith.constant 0 : index
    %c0_16 = arith.constant 0 : index
    %21 = vector.load %arg2[%c2, %c0_15, %c0_16] : memref<3x128x128xbf16, #tpu.memory_space<vmem>>, vector<1x128x128xbf16>
    %22 = vector.shape_cast %21 : vector<1x128x128xbf16> to vector<128x128xbf16>
    %cst_17 = arith.constant dense<0.000000e+00> : vector<8x128xf32>
    %23 = tpu.matmul %20, %22, %cst_17 {dimension_numbers = #tpu.dot_dimension_numbers<[1], [0], [0], [1], [0, 0, 1, 1], [], []>} : vector<8x128xbf16>, vector<128x128xbf16>, vector<8x128xf32> -> vector<8x128xf32>
    %c2_18 = arith.constant 2 : index
    %c0_19 = arith.constant 0 : index
    %c0_20 = arith.constant 0 : index
    %24 = vector.load %arg3[%c2_18, %c0_19, %c0_20] : memref<3x1x128xf32, #tpu.memory_space<vmem>>, vector<1x1x128xf32>
    %25 = vector.shape_cast %24 : vector<1x1x128xf32> to vector<1x128xf32>
    %26 = vector.broadcast %25 : vector<1x128xf32> to vector<8x128xf32>
    %27 = arith.addf %23, %26 : vector<8x128xf32>
    %28 = tpu.iota {dimensions = array<i32: 1>} : vector<8x128xi32>
    %c64_i32 = arith.constant 64 : i32
    %29 = vector.broadcast %c64_i32 : i32 to vector<8x128xi32>
    %30 = arith.cmpi slt, %28, %29 : vector<8x128xi32>
    %cst_21 = arith.constant 0xFF800000 : f32
    %31 = vector.broadcast %cst_21 : f32 to vector<8x128xf32>
    %32 = arith.select %30, %27, %31 : vector<8x128xi1>, vector<8x128xf32>
    %cst_22 = arith.constant dense<0xFF800000> : vector<8xf32>
    %33 = vector.multi_reduction <maximumf>, %32, %cst_22 [1] : vector<8x128xf32> to vector<8xf32>
    %34 = vector.shape_cast %33 : vector<8xf32> to vector<8x1xf32>
    %35 = vector.broadcast %34 : vector<8x1xf32> to vector<8x128xf32>
    %36 = arith.subf %32, %35 : vector<8x128xf32>
    %37 = math.exp %36 : vector<8x128xf32>
    %cst_23 = arith.constant dense<0.000000e+00> : vector<8xf32>
    %38 = vector.multi_reduction <add>, %37, %cst_23 [1] : vector<8x128xf32> to vector<8xf32>
    %39 = vector.shape_cast %38 : vector<8xf32> to vector<8x1xf32>
    %40 = vector.broadcast %39 : vector<8x1xf32> to vector<8x128xf32>
    %41 = arith.divf %37, %40 : vector<8x128xf32>
    %42 = arith.select %30, %41, %27 : vector<8x128xi1>, vector<8x128xf32>
    %c0_24 = arith.constant 0 : index
    %c0_25 = arith.constant 0 : index
    %43 = vector.load %arg4[%c0_24, %c0_25] : memref<8x128xf32, #tpu.memory_space<vmem>>, vector<8x128xf32>
    tpu.vector_store %arg4[%c0_24, %c0_25], %42 {strides = array<i32>} : memref<8x128xf32, #tpu.memory_space<vmem>>, vector<8x128xf32>,
    return
  }
  func.func @transform_0(%arg0: i32) -> (i32, i32) {
    %c0_i32 = arith.constant 0 : i32
    %c0_i32_0 = arith.constant 0 : i32
    return %arg0, %c0_i32 : i32, i32
  }
  func.func @transform_1(%arg0: i32) -> (i32, i32, i32) {
    %c0_i32 = arith.constant 0 : i32
    %c0_i32_0 = arith.constant 0 : i32
    %c0_i32_1 = arith.constant 0 : i32
    %c0_i32_2 = arith.constant 0 : i32
    return %c0_i32, %c0_i32_0, %c0_i32_1 : i32, i32, i32
  }
  func.func @transform_2(%arg0: i32) -> (i32, i32, i32) {
    %c0_i32 = arith.constant 0 : i32
    %c0_i32_0 = arith.constant 0 : i32
    %c0_i32_1 = arith.constant 0 : i32
    %c0_i32_2 = arith.constant 0 : i32
    return %c0_i32, %c0_i32_0, %c0_i32_1 : i32, i32, i32
  }
  func.func @transform_3(%arg0: i32) -> (i32, i32) {
    %c0_i32 = arith.constant 0 : i32
    %c0_i32_0 = arith.constant 0 : i32
    return %arg0, %c0_i32 : i32, i32
  }
}

</mosaic_0001>

<bundles_post_ra>
// kernel: tpu_custom_call.1
= control target key start
LH: loop header
LB: loop body
LE: loop exit
PB: predicated region body
PF: predicated region fallthrough
CT: control target
= control target key end

     0   :  { %8 = vsyncpa [#allocation3], 0  ;;  %s698_s0 = inlined_call_operand.hbm [shape: bf16[8,64], index: 0, kind: input, shape index: {}]   ;;  %s699_s1 = inlined_call_operand.hbm [shape: bf16[3,128,128], index: 1, kind: input, shape index: {}]   ;;  %s700_s2 = inlined_call_operand.vmem [shape: f32[3,1,128], index: 2, kind: input, shape index: {}]   ;;  %s701_s3 = inlined_call_operand.hbm [shape: f32[8,128], index: 3, kind: output, shape index: {}]  }
   0x1   :  { %9 = vsyncpa [#allocation6], 0 }
   0x2   :  { %10 = vsyncpa [#allocation4], 0  ;;  %s591_s12 = smov [#allocation2]   ;;  %s592_s14 = smov [#allocation5]  }
   0x3   :  { %s17_s13 = sshll.u32 %s591_s12, 4  ;;  %s26_s15 = sshll.u32 %s592_s14, 4  ;;  %s18_s13 = int_to_ptr.vmem [resolvable:$true] %s17_s13  ;;  %s618_s15 = int_to_ptr.vmem [resolvable:$true] %s26_s15 }
   0x4   :  { %s519_s18 = scalar_lea.hbm %s698_s0, 64 }
   0x5   :  { %p520_p0 = scmp.ne.s32.totalorder %s698_s0, %s519_s18  ;;  %p523_p1 = scmp.lt.u32.totalorder %s519_s18, %s698_s0 }
   0x7   :  { %p525_p2 = pnand %p523_p1, %p520_p0 }
   0x9   :  { %528 = shalt.err (!%p525_p2)
}
   0xa   :  { %s529_s23 = scalar_lea.vmem %s18_s13, 64  ;;  %p534_p4 = scmp.lt.s32.totalorder %s18_s13, %s18_s13 }
   0xb   :  { %p530_p3 = scmp.ne.s32.totalorder %s18_s13, %s529_s23  ;;  %p535_p5 = scmp.lt.s32.totalorder %s529_s23, %s529_s23 }
   0xd   :  { %p536_p6 = por %p535_p5, %p534_p4 }
   0xf   :  { %p537_p7 = pnand %p536_p6, %p530_p3 }
  0x11   :  { %540 = shalt.err (!%p537_p7)
}
  0x12   :  { %20 = dma.hbm_to_vmem [thread:$0]  %s698_s0, 64, %s18_s13, [#allocation3]  }
  0x13   :  { %s541_s28 = scalar_lea.hbm %s699_s1, 3072 }
  0x14   :  { %p542_p8 = scmp.ne.s32.totalorder %s699_s1, %s541_s28  ;;  %p545_p9 = scmp.lt.u32.totalorder %s541_s28, %s699_s1 }
  0x16   :  { %p547_p10 = pnand %p545_p9, %p542_p8 }
  0x18   :  { %550 = shalt.err (!%p547_p10)
}
  0x19   :  { %s551_s6 = scalar_lea.vmem %s618_s15, 3072  ;;  %p556_p12 = scmp.lt.s32.totalorder %s618_s15, %s618_s15 }
  0x1a   :  { %p552_p11 = scmp.ne.s32.totalorder %s618_s15, %s551_s6  ;;  %p557_p13 = scmp.lt.s32.totalorder %s551_s6, %s551_s6 }
  0x1c   :  { %p558_p0 = por %p557_p13, %p556_p12 }
  0x1e   :  { %p559_p1 = pnand %p558_p0, %p552_p11 }
  0x20   :  { %562 = shalt.err (!%p559_p1)
}
  0x21   :  { %s593_s0 = smov 64   ;;  %s594_s7 = smov 4  }
  0x22   :  { %32 = dma.hbm_to_vmem [thread:$0]  %s699_s1, 3072, %s618_s15, [#allocation6], %s593_s0, %s593_s0, %s594_s7  }
  0x23   :  { %585 = dma.done.wait [#allocation3], 64  }
  0x24   :  { %586 = vsyncadd [#allocation3], 4294967232 }
  0x25   :  { %587 = dma.done.wait [#allocation6], 3072  }
  0x26   :  { %588 = vsyncadd [#allocation6], 4294964224  ;;  %v595_v0 = vmov 0.0   ;;  %vm596_vm0 = vmmov 0   ;;  %v495_v1 = vld [vmem:[#allocation5] sm:$0xff]   ;;  %v496_v2 = vld [vmem:[#allocation5 + $0x8] sm:$0xff]   ;;  %v356_v38 = vlaneseq }
  0x27   :  { %436 = vmatprep.subr.bf16.mxu0 %v595_v0  ;;  %444 = vmatprep.mubr.msk.bf16.mxu0 %vm596_vm0, %v595_v0  ;;  %v499_v3 = vld [vmem:[#allocation5 + $0x40] sm:$0xff]   ;;  %v497_v4 = vld [vmem:[#allocation5 + $0x10] sm:$0xff]   ;;  %v500_v5 = vld [vmem:[#allocation5 + $0x48] sm:$0xff]   ;;  %vm82_vm1 = vcmask 523264   ;;  %s597_s15 = smov [#allocation7]  }
  0x28   :  { %448 = vmatprep.subr.bf16.mxu1 %v595_v0  ;;  %464 = vmatprep.mubr.msk.bf16.mxu1 %vm596_vm0, %v595_v0  ;;  %v498_v6 = vld [vmem:[#allocation5 + $0x18] sm:$0xff]   ;;  %v501_v7 = vld [vmem:[#allocation5 + $0x50] sm:$0xff]   ;;  %v503_v10 = vld [vmem:[#allocation5 + $0x60] sm:$0xff]   ;;  %v357_v39 = vand.u32 127, %v356_v38  ;;  %s377_s16 = sshll.u32 %s597_s15, 4  ;;  %s378_s16 = int_to_ptr.vmem [resolvable:$true] %s377_s16 }
  0x29   :  { %437 = vmatpush3.bf16.msra.mxu0 %v495_v1  ;;  %449 = vmatpush3.bf16.msra.mxu1 %v499_v3  ;;  %v50_v8 = vld [vmem:[#allocation2] sm:$0xf]  ;;  %v504_v11 = vld [vmem:[#allocation5 + $0x68] sm:$0xff]   ;;  %v505_v12 = vld [vmem:[#allocation5 + $0x70] sm:$0xff]   ;;  %p568_p3 = scmp.lt.s32.totalorder %s378_s16, %s378_s16 }
  0x2a   :  { %438 = vmatprep.subr.bf16.mxu0 %v595_v0  ;;  %450 = vmatprep.subr.bf16.mxu1 %v595_v0  ;;  %v502_v9 = vld [vmem:[#allocation5 + $0x58] sm:$0xff]   ;;  %v507_v14 = vld [vmem:[#allocation5 + $0x80] sm:$0xff]   ;;  %v508_v15 = vld [vmem:[#allocation5 + $0x88] sm:$0xff]   ;;  %vm358_vm2 = vcmp.lt.s32.totalorder %v357_v39, 64 }
  0x2b   :  { %v506_v13 = vld [vmem:[#allocation5 + $0x78] sm:$0xff]   ;;  %v509_v16 = vld [vmem:[#allocation5 + $0x90] sm:$0xff]   ;;  %v511_v18 = vld [vmem:[#allocation5 + $0xa0] sm:$0xff]  }
  0x2c   :  { %v510_v17 = vld [vmem:[#allocation5 + $0x98] sm:$0xff]   ;;  %v512_v19 = vld [vmem:[#allocation5 + $0xa8] sm:$0xff]   ;;  %v513_v28 = vld [vmem:[#allocation5 + $0xb0] sm:$0xff]  }
  0x2d   :  { %439 = vmatpush3.bf16.msra.mxu0 %v496_v2  ;;  %451 = vmatpush3.bf16.msra.mxu1 %v500_v5  ;;  %v387_v20 = vld [vmem:[%s700_s2] ss:$0 sm:$0xff]  ;;  %v394_v30 = vld [vmem:[%s700_s2 + $0x1] ss:$0 sm:$0xff]  ;;  %v404_v40 = vld [vmem:[%s700_s2 + $0x2] ss:$0 sm:$0xff] }
  0x2e   :  { %440 = vmatprep.subr.bf16.mxu0 %v595_v0  ;;  %452 = vmatprep.subr.bf16.mxu1 %v595_v0  ;;  %v514_v29 = vld [vmem:[#allocation5 + $0xb8] sm:$0xff]   ;;  %s563_s2 = scalar_lea.vmem %s378_s16, 128 }
  0x2f   :  { %p564_p2 = scmp.ne.s32.totalorder %s378_s16, %s563_s2  ;;  %p569_p4 = scmp.lt.s32.totalorder %s563_s2, %s563_s2 }
  0x31   :  { %441 = vmatpush3.bf16.msra.mxu0 %v497_v4  ;;  %453 = vmatpush3.bf16.msra.mxu1 %v501_v7  ;;  %p570_p5 = por %p569_p4, %p568_p3 }
  0x32   :  { %442 = vmatprep.subr.bf16.mxu0 %v595_v0  ;;  %454 = vmatprep.subr.bf16.mxu1 %v595_v0 }
  0x33   :  { %p571_p6 = pnand %p570_p5, %p564_p2 }
  0x35   :  { %443 = vmatpush3.bf16.msra.mxu0 %v498_v6  ;;  %455 = vmatpush3.bf16.msra.mxu1 %v502_v9 }
  0x36   :  { %468 = vmatprep.subr.bf16.mxu0 %v595_v0  ;;  %456 = vmatprep.subr.bf16.mxu1 %v595_v0 }
  0x38   :  { %445 = vmatmul.mubr.msk.bf16.vlgmr.msra.gmra.mrb[0].mxu0 %vm82_vm1, %v50_v8 }
  0x39   :  { %484 = vmatprep.mubr.msk.bf16.mxu0 %vm596_vm0, %v595_v0  ;;  %457 = vmatpush3.bf16.msra.mxu1 %v503_v10 }
  0x3a   :  { %458 = vmatprep.subr.bf16.mxu1 %v595_v0  ;;  %469 = vmatpush3.bf16.msra.mxu0 %v507_v14 }
  0x3b   :  { %470 = vmatprep.subr.bf16.mxu0 %v595_v0 }
  0x3d   :  { %459 = vmatpush3.bf16.msra.mxu1 %v504_v11 }
  0x3e   :  { %460 = vmatprep.subr.bf16.mxu1 %v595_v0  ;;  %471 = vmatpush3.bf16.msra.mxu0 %v508_v15 }
  0x3f   :  { %472 = vmatprep.subr.bf16.mxu0 %v595_v0 }
  0x41   :  { %461 = vmatpush3.bf16.msra.mxu1 %v505_v12 }
  0x42   :  { %462 = vmatprep.subr.bf16.mxu1 %v595_v0  ;;  %473 = vmatpush3.bf16.msra.mxu0 %v509_v16 }
  0x43   :  { %474 = vmatprep.subr.bf16.mxu0 %v595_v0 }
  0x45   :  { %463 = vmatpush3.bf16.msra.mxu1 %v506_v13 }
  0x46   :  { %475 = vmatpush3.bf16.msra.mxu0 %v510_v17 }
  0x47   :  { %476 = vmatprep.subr.bf16.mxu0 %v595_v0 }
  0x4a   :  { %477 = vmatpush3.bf16.msra.mxu0 %v511_v18 }
  0x4b   :  { %478 = vmatprep.subr.bf16.mxu0 %v595_v0 }
  0x4e   :  { %479 = vmatpush3.bf16.msra.mxu0 %v512_v19 }
  0x4f   :  { %480 = vmatprep.subr.bf16.mxu0 %v595_v0 }
  0x52   :  { %481 = vmatpush3.bf16.msra.mxu0 %v513_v28 }
  0x53   :  { %482 = vmatprep.subr.bf16.mxu0 %v595_v0 }
  0x56   :  { %483 = vmatpush3.bf16.msra.mxu0 %v514_v29 }
 0x10b   :  { %v120_v21 = vpop.f32.mrb[0].mxu0 }
 0x10c   :  { %v121_v22 = vadd.f32 %v387_v20, %v120_v21  ;;  %v446_v23 = vpop.f32.mrb[1].mxu0 }
 0x10d   :  { %v123_v24 = vpop.f32.mrb[2].mxu0 }
 0x10e   :  { %v126_v25 = vmax.f32 %v121_v22, 0.0  ;;  %v447_v26 = vpop.f32.mrb[3].mxu0 }
 0x110   :  { %v127_v27 = vpack.c.bf16 %v126_v25, %v126_v25 }
 0x112   :  { %465 = vmatmul.mubr.bf16.vlgmr.msra.gmra.mrb[0].mxu1 %v127_v27 }
 0x1e5   :  { %v235_v31 = vpop.f32.mrb[0].mxu1 }
 0x1e6   :  { %v236_v32 = vadd.f32 %v394_v30, %v235_v31  ;;  %v466_v33 = vpop.f32.mrb[1].mxu1 }
 0x1e7   :  { %v238_v34 = vpop.f32.mrb[2].mxu1 }
 0x1e8   :  { %v241_v35 = vmax.f32 %v236_v32, 0.0  ;;  %v467_v36 = vpop.f32.mrb[3].mxu1 }
 0x1ea   :  { %v242_v37 = vpack.c.bf16 %v241_v35, %v241_v35 }
 0x1ec   :  { %485 = vmatmul.mubr.bf16.vlgmr.msra.gmra.mrb[4].mxu0 %v242_v37 }
 0x2bf   :  { %v350_v41 = vpop.f32.mrb[4].mxu0 }
 0x2c0   :  { %v351_v42 = vadd.f32 %v404_v40, %v350_v41  ;;  %v486_v43 = vpop.f32.mrb[5].mxu0 }
 0x2c1   :  { %v353_v44 = vpop.f32.mrb[6].mxu0 }
 0x2c2   :  { %v487_v45 = vpop.f32.mrb[7].mxu0  ;;  %v359_v46 = vsel %vm358_vm2, %v351_v42, -inf }
 0x2c3   :  { %360 = vmax.xlane.f32.xlu0 %v359_v46 }
 0x350   :  { %v361_v47 = vpop.xlane.xlu0 %360 }
 0x351   :  { %v362_v48 = vsub.f32 %v359_v46, %v361_v47 }
 0x353   :  { %v363_v49 = vmul.f32 1.442695, %v362_v48 }
 0x355   :  { %515 = vpow2.f32 %v363_v49 }
 0x35f   :  { %v516_v50 = vpop.eup %515 }
 0x360   :  { %365 = vadd.xlane.f32.xlu0 %v516_v50 }
 0x3ed   :  { %v366_v51 = vpop.xlane.xlu0 %365 }
 0x3ee   :  { %517 = vrcp.f32 %v366_v51 }
 0x3f8   :  { %v518_v52 = vpop.eup %517 }
 0x3f9   :  { %v368_v53 = vmul.f32 %v518_v52, %v516_v50 }
 0x3fb   :  { %v369_v54 = vsel %vm358_vm2, %v368_v53, %v351_v42 }
 0x3fc   :  { %370 = vst [vmem:[#allocation7] sm:$0xff] %v369_v54 }
 0x3fd   :  { %574 = shalt.err (!%p571_p6)
}
 0x3fe   :  { %s575_s19 = scalar_lea.hbm %s701_s3, 128 }
 0x3ff   :  { %p576_p7 = scmp.ne.s32.totalorder %s701_s3, %s575_s19  ;;  %p579_p8 = scmp.lt.u32.totalorder %s575_s19, %s701_s3 }
 0x401   :  { %p581_p9 = pnand %p579_p8, %p576_p7 }
 0x403   :  { %584 = shalt.err (!%p581_p9)
}
 0x404   :  { %380 = dma.vmem_to_hbm [thread:$0]  %s378_s16, 128, %s701_s3, [#allocation4]  }
 0x405   :  { %589 = dma.done.wait [#allocation4], 128  }
 0x406   :  { %590 = vsyncadd [#allocation4], 4294967168 }
 0x407   :  { %384 = vsyncpa [#allocation3], 1 }
 0x408   :  { %385 = vsyncpa [#allocation6], 1 }
 0x409   :  { %386 = vsyncpa [#allocation4], 1 }

</bundles_post_ra>
